<compile_context>
chip_gen: v6e
topology: v6e:2x2x1
jax: 0.10.0
libtpu: 0.0.40
codegen_flags: <defaults>
</compile_context>

<pallas_src>
import jax
import jax.numpy as jnp
from jax.experimental import pallas as pl
from jax.experimental.pallas import tpu as pltpu

EPS = 1e-5
SLOPE = 0.01  # nn.LeakyReLU default negative_slope


def _leaky(a):
    return jnp.where(a > 0, a, SLOPE * a)


def _round_up(a, b):
    return (a + b - 1) // b * b


def _make_kernel(K, Wc, start, cnt1, cnt2):
    inv_cnt1 = 1.0 / float(cnt1)
    inv_cnt2 = 1.0 / float(cnt2)

    def kernel(xfp_ref, w1_ref, w2_ref, g1_ref, be1_ref, g2_ref, be2_ref,
               m1_ref, m2_ref, o_ref, h1s_ref):
        # xfp_ref: (C, Wt)  flattened, zero-padded (C, N*L) slab
        # w1_ref : (F, K*C) im2col conv1 weights   w2_ref: (F, K*F)
        # g/be   : (F, 1)   m1/m2: (1, Wc) validity masks
        # o_ref  : (F, Wc)  h1s_ref: (F, Wt) VMEM scratch
        F, Wt = h1s_ref.shape

        # ---- conv1: K shifted windows stacked on the contraction dim (im2col),
        #      one (F, K*C) @ (K*C, Wc) MXU matmul covering the whole batch ----
        stacked1 = jnp.concatenate(
            [xfp_ref[:, k:k + Wc] for k in range(K)], axis=0)
        h1 = jnp.dot(w1_ref[...], stacked1, preferred_element_type=jnp.float32)

        # ---- BN1: training-mode batch stats (masked, centered two-pass) ----
        m1 = m1_ref[...]
        mean1 = jnp.sum(h1 * m1, axis=1, keepdims=True) * inv_cnt1
        d1 = (h1 - mean1) * m1
        var1 = jnp.sum(d1 * d1, axis=1, keepdims=True) * inv_cnt1
        scale1 = jax.lax.rsqrt(var1 + EPS) * g1_ref[...]
        a1 = _leaky((h1 - mean1) * scale1 + be1_ref[...])

        # park activations (+ zero halo) in VMEM scratch: bounds vreg live ranges
        # and lets conv2 take shifted windows exactly like conv1.
        h1s_ref[:, :Wc] = a1
        h1s_ref[:, Wc:Wt] = jnp.zeros((F, Wt - Wc), jnp.float32)

        # ---- conv2 ----
        stacked2 = jnp.concatenate(
            [h1s_ref[:, k:k + Wc] for k in range(K)], axis=0)
        h2 = jnp.dot(w2_ref[...], stacked2, preferred_element_type=jnp.float32)

        # ---- BN2 ----
        m2 = m2_ref[...]
        mean2 = jnp.sum(h2 * m2, axis=1, keepdims=True) * inv_cnt2
        d2 = (h2 - mean2) * m2
        var2 = jnp.sum(d2 * d2, axis=1, keepdims=True) * inv_cnt2
        scale2 = jax.lax.rsqrt(var2 + EPS) * g2_ref[...]

        # ---- center-crop residual (single shifted window of x) + LeakyReLU ----
        res = xfp_ref[:, start:start + Wc]
        o_ref[...] = _leaky((h2 - mean2) * scale2 + be2_ref[...] + res)

    return kernel


def basic_block(x, w1, b1, g1, be1, w2, b2, g2, be2):
    """x: (N, C, L) f32; w1: (F, C, K); w2: (F, F, K); vectors: (F,).

    Conv biases b1/b2 are accepted for API parity with the PyTorch module but are
    not used: a per-channel additive bias is exactly cancelled by the
    training-mode BatchNorm mean subtraction that immediately follows each conv.
    """
    del b1, b2
    N, C, L = x.shape
    F, Cw, K = w1.shape
    assert Cw == C and w2.shape == (F, F, K)
    assert C == F, "residual add requires in_channels == features"
    L1 = L - K + 1
    L2 = L1 - K + 1
    assert L2 > 0
    start = (L - L2) // 2          # == K - 1

    NL = N * L
    Wc = _round_up(NL, 128)                      # lane-dense compute/output width
    halo = _round_up(max(K - 1, start, 1), 128)  # room for shifted windows
    Wt = Wc + halo

    # lane-dense (C, N*L) slab, zero-padded to Wt columns
    xf = jnp.transpose(x, (1, 0, 2)).reshape(C, NL).astype(jnp.float32)
    xfp = jnp.pad(xf, ((0, 0), (0, Wt - NL)))

    # im2col weights: flat[f, k*C + c] = w[f, c, k]  (matches the tap stacking order)
    w1f = jnp.transpose(w1, (0, 2, 1)).reshape(F, K * C).astype(jnp.float32)
    w2f = jnp.transpose(w2, (0, 2, 1)).reshape(F, K * F).astype(jnp.float32)

    col = lambda v: v.reshape(F, 1).astype(jnp.float32)

    # validity masks for the flattened layout: columns in the inter-batch tail
    # (l >= L1 / l >= L2) or in the zero padding are excluded from BN statistics.
    cols = jnp.arange(Wc)
    within = cols < NL
    pos = cols % L
    m1 = (within & (pos < L1)).astype(jnp.float32).reshape(1, Wc)
    m2 = (within & (pos < L2)).astype(jnp.float32).reshape(1, Wc)

    kernel = _make_kernel(K, Wc, start, N * L1, N * L2)

    # VMEM footprint (inputs + output + scratch) with generous headroom for
    # intermediates; capped well under physical VMEM.
    nbytes = 4 * (C * Wt + F * K * C + F * K * F + 4 * F + 2 * Wc
                  + F * Wc + F * Wt)
    vmem_limit = int(min(128 << 20, max(16 << 20, 4 * nbytes)))

    vmem = pl.BlockSpec(memory_space=pltpu.MemorySpace.VMEM)
    out_flat = pl.pallas_call(
        kernel,
        out_shape=jax.ShapeDtypeStruct((F, Wc), jnp.float32),
        in_specs=[vmem] * 9,
        out_specs=vmem,
        scratch_shapes=[pltpu.VMEM((F, Wt), jnp.float32)],
        compiler_params=pltpu.CompilerParams(vmem_limit_bytes=vmem_limit),
    )(xfp, w1f, w2f, col(g1), col(be1), col(g2), col(be2), m1, m2)

    # un-flatten: valid output columns for batch n are n*L + [0, L2)
    out = out_flat[:, :NL].reshape(F, N, L)[:, :, :L2]
    return jnp.transpose(out, (1, 0, 2))


# ---- pure-JAX reference for verification ----
def ref_basic_block(x, w1, b1, g1, be1, w2, b2, g2, be2):
    def conv1d(h, w, b):
        Kk = w.shape[-1]
        Lo = h.shape[-1] - Kk + 1
        out = jnp.zeros((h.shape[0], w.shape[0], Lo), jnp.float32)
        for kk in range(Kk):
            out = out + jnp.einsum('ncl,fc->nfl', h[:, :, kk:kk + Lo], w[:, :, kk])
        return out + b[None, :, None]

    def bn(h, g, be):
        mean = h.mean(axis=(0, 2), keepdims=True)
        var = ((h - mean) ** 2).mean(axis=(0, 2), keepdims=True)  # biased
        return (h - mean) / jnp.sqrt(var + EPS) * g[None, :, None] + be[None, :, None]

    h = _leaky(bn(conv1d(x, w1, b1), g1, be1))
    h = bn(conv1d(h, w2, b2), g2, be2)
    L2 = h.shape[-1]
    start = (x.shape[-1] - L2) // 2
    return _leaky(h + x[:, :, start:start + L2])


if __name__ == "__main__":
    # in_channels must equal features for the residual add (as in the PyTorch module)
    N, C, L, K = 3, 8, 50, 3
    F = C

    key = jax.random.PRNGKey(0)
    ks = jax.random.split(key, 6)
    x = jax.random.normal(ks[0], (N, C, L), jnp.float32)
    w1 = jax.random.normal(ks[1], (F, C, K), jnp.float32) * 0.2
    b1 = jax.random.normal(ks[2], (F,), jnp.float32) * 0.1
    w2 = jax.random.normal(ks[3], (F, F, K), jnp.float32) * 0.2
    b2 = jax.random.normal(ks[4], (F,), jnp.float32) * 0.1
    g1 = 1.0 + 0.1 * jax.random.normal(ks[5], (F,), jnp.float32)
    be1 = jnp.linspace(-0.1, 0.1, F, dtype=jnp.float32)
    g2 = jnp.linspace(0.9, 1.1, F, dtype=jnp.float32)
    be2 = jnp.linspace(0.1, -0.1, F, dtype=jnp.float32)

    out = basic_block(x, w1, b1, g1, be1, w2, b2, g2, be2)
    out = jax.block_until_ready(out)

    ref = ref_basic_block(x, w1, b1, g1, be1, w2, b2, g2, be2)
    assert out.shape == (N, F, L - 2 * (K - 1))
    assert jnp.allclose(out, ref, rtol=1e-4, atol=1e-4), "mismatch vs reference"

    print("KERNEL_OK")
</pallas_src>

<mosaic_0001>
module attributes {stable_mosaic.version = 11 : i64} {
  func.func @kernel(%arg0: memref<8x384xf32, #tpu.memory_space<vmem>>, %arg1: memref<8x24xf32, #tpu.memory_space<vmem>>, %arg2: memref<8x24xf32, #tpu.memory_space<vmem>>, %arg3: memref<8x1xf32, #tpu.memory_space<vmem>>, %arg4: memref<8x1xf32, #tpu.memory_space<vmem>>, %arg5: memref<8x1xf32, #tpu.memory_space<vmem>>, %arg6: memref<8x1xf32, #tpu.memory_space<vmem>>, %arg7: memref<1x256xf32, #tpu.memory_space<vmem>>, %arg8: memref<1x256xf32, #tpu.memory_space<vmem>>, %arg9: memref<8x256xf32, #tpu.memory_space<vmem>>, %arg10: memref<8x384xf32, #tpu.memory_space<vmem>>) attributes {dimension_semantics = [], scalar_prefetch = 0 : i64, scratch_operands = 1 : i64, tpu.core_type = #tpu.core_type<tc>} {
    %c0 = arith.constant 0 : index
    %c0_0 = arith.constant 0 : index
    %0 = vector.load %arg0[%c0, %c0_0] : memref<8x384xf32, #tpu.memory_space<vmem>>, vector<8x256xf32>
    %c0_1 = arith.constant 0 : index
    %c1 = arith.constant 1 : index
    %1 = vector.load %arg0[%c0_1, %c1] : memref<8x384xf32, #tpu.memory_space<vmem>>, vector<8x256xf32>
    %c0_2 = arith.constant 0 : index
    %c2 = arith.constant 2 : index
    %2 = vector.load %arg0[%c0_2, %c2] : memref<8x384xf32, #tpu.memory_space<vmem>>, vector<8x256xf32>
    %3 = tpu.concatenate %0, %1, %2 in 0 : vector<8x256xf32>, vector<8x256xf32>, vector<8x256xf32> -> vector<24x256xf32>
    %c0_3 = arith.constant 0 : index
    %c0_4 = arith.constant 0 : index
    %4 = vector.load %arg1[%c0_3, %c0_4] : memref<8x24xf32, #tpu.memory_space<vmem>>, vector<8x24xf32>
    %cst = arith.constant dense<0.000000e+00> : vector<8x256xf32>
    %5 = tpu.matmul %4, %3, %cst {dimension_numbers = #tpu.dot_dimension_numbers<[1], [0], [0], [1], [0, 0, 1, 1], [], []>} : vector<8x24xf32>, vector<24x256xf32>, vector<8x256xf32> -> vector<8x256xf32>
    %c0_5 = arith.constant 0 : index
    %c0_6 = arith.constant 0 : index
    %6 = vector.load %arg7[%c0_5, %c0_6] : memref<1x256xf32, #tpu.memory_space<vmem>>, vector<1x256xf32>
    %7 = vector.broadcast %6 : vector<1x256xf32> to vector<8x256xf32>
    %8 = arith.mulf %5, %7 : vector<8x256xf32>
    %cst_7 = arith.constant dense<0.000000e+00> : vector<8xf32>
    %9 = vector.multi_reduction <add>, %8, %cst_7 [1] : vector<8x256xf32> to vector<8xf32>
    %10 = vector.shape_cast %9 : vector<8xf32> to vector<8x1xf32>
    %cst_8 = arith.constant 0.0069444445 : f32
    %11 = vector.broadcast %cst_8 : f32 to vector<8x1xf32>
    %12 = arith.mulf %10, %11 : vector<8x1xf32>
    %13 = vector.broadcast %12 : vector<8x1xf32> to vector<8x256xf32>
    %14 = arith.subf %5, %13 : vector<8x256xf32>
    %15 = vector.broadcast %6 : vector<1x256xf32> to vector<8x256xf32>
    %16 = arith.mulf %14, %15 : vector<8x256xf32>
    %17 = arith.mulf %16, %16 : vector<8x256xf32>
    %cst_9 = arith.constant dense<0.000000e+00> : vector<8xf32>
    %18 = vector.multi_reduction <add>, %17, %cst_9 [1] : vector<8x256xf32> to vector<8xf32>
    %19 = vector.shape_cast %18 : vector<8xf32> to vector<8x1xf32>
    %cst_10 = arith.constant 0.0069444445 : f32
    %20 = vector.broadcast %cst_10 : f32 to vector<8x1xf32>
    %21 = arith.mulf %19, %20 : vector<8x1xf32>
    %cst_11 = arith.constant 9.99999974E-6 : f32
    %22 = vector.broadcast %cst_11 : f32 to vector<8x1xf32>
    %23 = arith.addf %21, %22 : vector<8x1xf32>
    %24 = math.rsqrt %23 : vector<8x1xf32>
    %c0_12 = arith.constant 0 : index
    %c0_13 = arith.constant 0 : index
    %25 = vector.load %arg3[%c0_12, %c0_13] : memref<8x1xf32, #tpu.memory_space<vmem>>, vector<8x1xf32>
    %26 = arith.mulf %24, %25 : vector<8x1xf32>
    %27 = vector.broadcast %12 : vector<8x1xf32> to vector<8x256xf32>
    %28 = arith.subf %5, %27 : vector<8x256xf32>
    %29 = vector.broadcast %26 : vector<8x1xf32> to vector<8x256xf32>
    %30 = arith.mulf %28, %29 : vector<8x256xf32>
    %c0_14 = arith.constant 0 : index
    %c0_15 = arith.constant 0 : index
    %31 = vector.load %arg4[%c0_14, %c0_15] : memref<8x1xf32, #tpu.memory_space<vmem>>, vector<8x1xf32>
    %32 = vector.broadcast %31 : vector<8x1xf32> to vector<8x256xf32>
    %33 = arith.addf %30, %32 : vector<8x256xf32>
    %cst_16 = arith.constant 0.000000e+00 : f32
    %34 = vector.broadcast %cst_16 : f32 to vector<8x256xf32>
    %35 = arith.cmpf ogt, %33, %34 : vector<8x256xf32>
    %cst_17 = arith.constant 0.00999999977 : f32
    %36 = vector.broadcast %cst_17 : f32 to vector<8x256xf32>
    %37 = arith.mulf %36, %33 : vector<8x256xf32>
    %38 = arith.select %35, %33, %37 : vector<8x256xi1>, vector<8x256xf32>
    %c0_18 = arith.constant 0 : index
    %c0_19 = arith.constant 0 : index
    %39 = vector.load %arg10[%c0_18, %c0_19] : memref<8x384xf32, #tpu.memory_space<vmem>>, vector<8x256xf32>
    tpu.vector_store %arg10[%c0_18, %c0_19], %38 {strides = array<i32>} : memref<8x384xf32, #tpu.memory_space<vmem>>, vector<8x256xf32>,
    %cst_20 = arith.constant 0.000000e+00 : f32
    %40 = vector.broadcast %cst_20 : f32 to vector<8x128xf32>
    %c0_21 = arith.constant 0 : index
    %c256 = arith.constant 256 : index
    %41 = vector.load %arg10[%c0_21, %c256] : memref<8x384xf32, #tpu.memory_space<vmem>>, vector<8x128xf32>
    tpu.vector_store %arg10[%c0_21, %c256], %40 {strides = array<i32>} : memref<8x384xf32, #tpu.memory_space<vmem>>, vector<8x128xf32>,
    %c0_22 = arith.constant 0 : index
    %c0_23 = arith.constant 0 : index
    %42 = vector.load %arg10[%c0_22, %c0_23] : memref<8x384xf32, #tpu.memory_space<vmem>>, vector<8x256xf32>
    %c0_24 = arith.constant 0 : index
    %c1_25 = arith.constant 1 : index
    %43 = vector.load %arg10[%c0_24, %c1_25] : memref<8x384xf32, #tpu.memory_space<vmem>>, vector<8x256xf32>
    %c0_26 = arith.constant 0 : index
    %c2_27 = arith.constant 2 : index
    %44 = vector.load %arg10[%c0_26, %c2_27] : memref<8x384xf32, #tpu.memory_space<vmem>>, vector<8x256xf32>
    %45 = tpu.concatenate %42, %43, %44 in 0 : vector<8x256xf32>, vector<8x256xf32>, vector<8x256xf32> -> vector<24x256xf32>
    %c0_28 = arith.constant 0 : index
    %c0_29 = arith.constant 0 : index
    %46 = vector.load %arg2[%c0_28, %c0_29] : memref<8x24xf32, #tpu.memory_space<vmem>>, vector<8x24xf32>
    %cst_30 = arith.constant dense<0.000000e+00> : vector<8x256xf32>
    %47 = tpu.matmul %46, %45, %cst_30 {dimension_numbers = #tpu.dot_dimension_numbers<[1], [0], [0], [1], [0, 0, 1, 1], [], []>} : vector<8x24xf32>, vector<24x256xf32>, vector<8x256xf32> -> vector<8x256xf32>
    %c0_31 = arith.constant 0 : index
    %c0_32 = arith.constant 0 : index
    %48 = vector.load %arg8[%c0_31, %c0_32] : memref<1x256xf32, #tpu.memory_space<vmem>>, vector<1x256xf32>
    %49 = vector.broadcast %48 : vector<1x256xf32> to vector<8x256xf32>
    %50 = arith.mulf %47, %49 : vector<8x256xf32>
    %cst_33 = arith.constant dense<0.000000e+00> : vector<8xf32>
    %51 = vector.multi_reduction <add>, %50, %cst_33 [1] : vector<8x256xf32> to vector<8xf32>
    %52 = vector.shape_cast %51 : vector<8xf32> to vector<8x1xf32>
    %cst_34 = arith.constant 0.00724637694 : f32
    %53 = vector.broadcast %cst_34 : f32 to vector<8x1xf32>
    %54 = arith.mulf %52, %53 : vector<8x1xf32>
    %55 = vector.broadcast %54 : vector<8x1xf32> to vector<8x256xf32>
    %56 = arith.subf %47, %55 : vector<8x256xf32>
    %57 = vector.broadcast %48 : vector<1x256xf32> to vector<8x256xf32>
    %58 = arith.mulf %56, %57 : vector<8x256xf32>
    %59 = arith.mulf %58, %58 : vector<8x256xf32>
    %cst_35 = arith.constant dense<0.000000e+00> : vector<8xf32>
    %60 = vector.multi_reduction <add>, %59, %cst_35 [1] : vector<8x256xf32> to vector<8xf32>
    %61 = vector.shape_cast %60 : vector<8xf32> to vector<8x1xf32>
    %cst_36 = arith.constant 0.00724637694 : f32
    %62 = vector.broadcast %cst_36 : f32 to vector<8x1xf32>
    %63 = arith.mulf %61, %62 : vector<8x1xf32>
    %cst_37 = arith.constant 9.99999974E-6 : f32
    %64 = vector.broadcast %cst_37 : f32 to vector<8x1xf32>
    %65 = arith.addf %63, %64 : vector<8x1xf32>
    %66 = math.rsqrt %65 : vector<8x1xf32>
    %c0_38 = arith.constant 0 : index
    %c0_39 = arith.constant 0 : index
    %67 = vector.load %arg5[%c0_38, %c0_39] : memref<8x1xf32, #tpu.memory_space<vmem>>, vector<8x1xf32>
    %68 = arith.mulf %66, %67 : vector<8x1xf32>
    %c0_40 = arith.constant 0 : index
    %c2_41 = arith.constant 2 : index
    %69 = vector.load %arg0[%c0_40, %c2_41] : memref<8x384xf32, #tpu.memory_space<vmem>>, vector<8x256xf32>
    %70 = vector.broadcast %54 : vector<8x1xf32> to vector<8x256xf32>
    %71 = arith.subf %47, %70 : vector<8x256xf32>
    %72 = vector.broadcast %68 : vector<8x1xf32> to vector<8x256xf32>
    %73 = arith.mulf %71, %72 : vector<8x256xf32>
    %c0_42 = arith.constant 0 : index
    %c0_43 = arith.constant 0 : index
    %74 = vector.load %arg6[%c0_42, %c0_43] : memref<8x1xf32, #tpu.memory_space<vmem>>, vector<8x1xf32>
    %75 = vector.broadcast %74 : vector<8x1xf32> to vector<8x256xf32>
    %76 = arith.addf %73, %75 : vector<8x256xf32>
    %77 = arith.addf %76, %69 : vector<8x256xf32>
    %cst_44 = arith.constant 0.000000e+00 : f32
    %78 = vector.broadcast %cst_44 : f32 to vector<8x256xf32>
    %79 = arith.cmpf ogt, %77, %78 : vector<8x256xf32>
    %cst_45 = arith.constant 0.00999999977 : f32
    %80 = vector.broadcast %cst_45 : f32 to vector<8x256xf32>
    %81 = arith.mulf %80, %77 : vector<8x256xf32>
    %82 = arith.select %79, %77, %81 : vector<8x256xi1>, vector<8x256xf32>
    %c0_46 = arith.constant 0 : index
    %c0_47 = arith.constant 0 : index
    %83 = vector.load %arg9[%c0_46, %c0_47] : memref<8x256xf32, #tpu.memory_space<vmem>>, vector<8x256xf32>
    tpu.vector_store %arg9[%c0_46, %c0_47], %82 {strides = array<i32>} : memref<8x256xf32, #tpu.memory_space<vmem>>, vector<8x256xf32>,
    return
  }
}

</mosaic_0001>

<bundles_post_ra>
// kernel: tpu_custom_call.1
= control target key start
LH: loop header
LB: loop body
LE: loop exit
PB: predicated region body
PF: predicated region fallthrough
CT: control target
= control target key end

     0   :  { %14 = vsyncpa [#allocation4], 0  ;;  %s604_s0 = inlined_call_operand.vmem [shape: f32[8,384], index: 0, kind: input, shape index: {}]   ;;  %s605_s1 = inlined_call_operand.vmem [shape: f32[8,24], index: 1, kind: input, shape index: {}]   ;;  %s606_s2 = inlined_call_operand.hbm [shape: f32[8,24], index: 2, kind: input, shape index: {}]   ;;  %s607_s3 = inlined_call_operand.vmem [shape: f32[8,1], index: 3, kind: input, shape index: {}]   ;;  %s608_s4 = inlined_call_operand.vmem [shape: f32[8,1], index: 4, kind: input, shape index: {}]   ;;  %s609_s5 = inlined_call_operand.vmem [shape: f32[8,1], index: 5, kind: input, shape index: {}]   ;;  %s610_s6 = inlined_call_operand.vmem [shape: f32[8,1], index: 6, kind: input, shape index: {}]   ;;  %s611_s7 = inlined_call_operand.vmem [shape: f32[1,256], index: 7, kind: input, shape index: {}]   ;;  %s612_s8 = inlined_call_operand.vmem [shape: f32[1,256], index: 8, kind: input, shape index: {}]   ;;  %s613_s9 = inlined_call_operand.hbm [shape: f32[8,256], index: 9, kind: output, shape index: {}]  }
   0x1   :  { %15 = vsyncpa [#allocation5], 0  ;;  %s456_s30 = smov [#allocation3]  }
   0x2   :  { %s26_s10 = sshll.u32 %s456_s30, 4  ;;  %s27_s10 = int_to_ptr.vmem [resolvable:$true] %s26_s10 }
   0x3   :  { %s420_s11 = scalar_lea.vmem %s27_s10, 128  ;;  %p425_p1 = scmp.lt.s32.totalorder %s27_s10, %s27_s10 }
   0x4   :  { %p421_p0 = scmp.ne.s32.totalorder %s27_s10, %s420_s11  ;;  %p426_p2 = scmp.lt.s32.totalorder %s420_s11, %s420_s11 }
   0x6   :  { %p427_p3 = por %p426_p2, %p425_p1 }
   0x8   :  { %p428_p4 = pnand %p427_p3, %p421_p0 }
   0xa   :  { %431 = shalt.err (!%p428_p4)
}
   0xb   :  { %29 = dma.hbm_to_vmem [thread:$0]  %s606_s2, 128, %s27_s10, [#allocation4]  }
   0xc   :  { %452 = dma.done.wait [#allocation4], 128  }
   0xd   :  { %453 = vsyncadd [#allocation4], 4294967168  ;;  %v518_v0 = vld [vmem:[%s604_s0 + $0x8] sm:$0xff]  ;;  %v523_v1 = vld [vmem:[%s604_s0] sm:$0xff]  ;;  %v457_v2 = vmov 0.0   ;;  %s458_s18 = smov 126   ;;  %v153_v15 = vlaneseq }
   0xe   :  { %144 = vmatprep.mubr.f32.mxu0 %v457_v2  ;;  %303 = vmatprep.mubr.f32.mxu1 %v457_v2  ;;  %v532_v3 = vld [vmem:[%s604_s0 + $0x10] sm:$0xff]  ;;  %s459_s20 = smov 127   ;;  %vm70_vm0 = vcmask 1031168   ;;  %vm59_vm1 = vcmask 1039360   ;;  %v75_v14 = vld [vmem:[%s605_s1] sm:$0xff]  ;;  %vm76_vm2 = vcmask 195584  }
   0xf   :  { %66 = vrot.lane.b32.xlu0 %v518_v0, %s458_s18  ;;  %64 = vrot.lane.b32.xlu1 %v523_v1, %s458_s18  ;;  %v552_v16 = vshrl.u32 %v153_v15, 7  ;;  %v151_v19 = vld [vmem:[%s611_s7] sm:$0x3]  ;;  %v460_v36 = vmov 0  }
  0x10   :  { %406 = vset.pattern.permute.xlu0 %v460_v36  ;;  %407 = vset.pattern.permute.xlu1 %v460_v36  ;;  %v190_v37 = vld [vmem:[%s608_s4] sm:$0xff] }
  0x11   :  { %v155_v17 = vsub.s32 0, %v552_v16  ;;  %v159_v18 = vsub.s32 1, %v552_v16  ;;  %v181_v41 = vld [vmem:[%s607_s3] sm:$0xff] }
  0x12   :  { %v352_v16 = vld [vmem:[%s610_s6] sm:$0xff] }
  0x13   :  { %68 = vrot.lane.b32.xlu0 %v532_v3, %s458_s18  ;;  %55 = vrot.lane.b32.xlu1 %v518_v0, %s459_s20  ;;  %v156_v20 = vrot.slane %v151_v19, %v155_v17  ;;  %v160_v21 = vrot.slane %v151_v19, %v159_v18 }
  0x17   :  { %57 = vrot.lane.b32.xlu0 %v532_v3, %s459_s20  ;;  %53 = vrot.lane.b32.xlu1 %v523_v1, %s459_s20 }
  0x81   :  { %v67_v4 = vpop.permute.xlu0 %66  ;;  %v65_v5 = vpop.permute.xlu1 %64 }
  0x82   :  { %v71_v9 = vsel %vm70_vm0, %v65_v5, %v67_v4 }
  0x85   :  { %v69_v6 = vpop.permute.xlu0 %68  ;;  %v56_v7 = vpop.permute.xlu1 %55 }
  0x86   :  { %v72_v8 = vsel %vm70_vm0, %v67_v4, %v69_v6  ;;  %v310_v4 = vld [vmem:[%s612_s8] sm:$0x3] }
  0x87   :  { %106 = vmatprep.subr.mxu0 %v72_v8  ;;  %v315_v5 = vrot.slane %v310_v4, %v155_v17  ;;  %v319_v6 = vrot.slane %v310_v4, %v159_v18 }
  0x88   :  { %107 = vmatpush1.msra.mxu0 %v71_v9 }
  0x89   :  { %v58_v10 = vpop.permute.xlu0 %57  ;;  %v54_v11 = vpop.permute.xlu1 %53 }
  0x8a   :  { %v61_v12 = vsel %vm59_vm1, %v56_v7, %v58_v10  ;;  %v60_v13 = vsel %vm59_vm1, %v54_v11, %v56_v7 }
  0x8b   :  { %108 = vmatprep.subr.mxu0 %v61_v12 }
  0x8c   :  { %109 = vmatpush1.msra.mxu0 %v60_v13 }
  0x8d   :  { %110 = vmatprep.subr.mxu0 %v518_v0 }
  0x8e   :  { %111 = vmatpush1.msra.mxu0 %v523_v1 }
  0x8f   :  { %398 = vmatmul.mubr.msk.f32.vlgmr.msra.gmra.mxu0 %vm76_vm2, %v75_v14 }
 0x14f   :  { %v146_v22 = vpop.f32.mrf.mxu0 }
 0x150   :  { %v163_v24 = vmul.f32 %v156_v20, %v146_v22 }
 0x151   :  { %v148_v23 = vpop.f32.mrf.mxu0 }
 0x152   :  { %v164_v25 = vmul.f32 %v160_v21, %v148_v23 }
 0x154   :  { %v165_v26 = vadd.f32 %v164_v25, %v163_v24  ;;  %v340_v24 = vld [vmem:[%s609_s5] sm:$0xff]  ;;  %s461_s5 = smov [#allocation6]  }
 0x155   :  { %s389_s6 = sshll.u32 %s461_s5, 4  ;;  %s390_s6 = int_to_ptr.vmem [resolvable:$true] %s389_s6 }
 0x156   :  { %166 = vadd.xlane.f32.xlu0 %v165_v26  ;;  %s432_s29 = scalar_lea.vmem %s390_s6, 256  ;;  %p437_p6 = scmp.lt.s32.totalorder %s390_s6, %s390_s6 }
 0x157   :  { %p433_p5 = scmp.ne.s32.totalorder %s390_s6, %s432_s29  ;;  %p438_p7 = scmp.lt.s32.totalorder %s432_s29, %s432_s29 }
 0x159   :  { %p439_p8 = por %p438_p7, %p437_p6 }
 0x15b   :  { %p440_p9 = pnand %p439_p8, %p433_p5 }
 0x1df   :  { %v167_v27 = vpop.xlane.xlu0 %166 }
 0x1e0   :  { %v168_v28 = vmul.f32 0.0069444445, %v167_v27 }
 0x1e2   :  { %v169_v29 = vsub.f32 %v146_v22, %v168_v28  ;;  %v170_v30 = vsub.f32 %v148_v23, %v168_v28 }
 0x1e4   :  { %v171_v31 = vmul.f32 %v169_v29, %v156_v20  ;;  %v172_v32 = vmul.f32 %v170_v30, %v160_v21 }
 0x1e6   :  { %v173_v33 = vmul.f32 %v171_v31, %v171_v31  ;;  %v174_v34 = vmul.f32 %v172_v32, %v172_v32 }
 0x1e8   :  { %v175_v35 = vadd.f32 %v174_v34, %v173_v33 }
 0x1ea   :  { %176 = vadd.xlane.f32.xlu1 %v175_v35 }
 0x1fb   :  { %193 = vperm.xlu1 %407, %v190_v37  }
 0x1ff   :  { %229 = vrot.lane.b32.xlu1 %v457_v2, %s458_s18 }
 0x203   :  { %219 = vrot.lane.b32.xlu1 %v457_v2, %s459_s20  ;;  %v235_v2 = vld [vmem:[#allocation3] sm:$0xff] }
 0x273   :  { %v177_v38 = vpop.xlane.xlu1 %176 }
 0x274   :  { %v178_v39 = vmul.f32 0.0069444445, %v177_v38 }
 0x276   :  { %v179_v40 = vadd.f32 1e-05, %v178_v39 }
 0x277   :  { %v194_v45 = vpop.permute.xlu1 %193 }
 0x278   :  { %408 = vrsqrt.f32 %v179_v40 }
 0x27b   :  { %v230_v54 = vpop.permute.xlu1 %229 }
 0x27f   :  { %v220_v55 = vpop.permute.xlu1 %219 }
 0x285   :  { %v409_v42 = vpop.eup %408 }
 0x286   :  { %v182_v43 = vmul.f32 %v409_v42, %v181_v41 }
 0x288   :  { %185 = vperm.xlu0 %406, %v182_v43  }
 0x303   :  { %v186_v44 = vpop.permute.xlu0 %185 }
 0x304   :  { %v188_v46 = vmul.f32 %v186_v44, %v169_v29  ;;  %v189_v47 = vmul.f32 %v186_v44, %v170_v30 }
 0x306   :  { %v196_v48 = vadd.f32 %v194_v45, %v188_v46  ;;  %v197_v49 = vadd.f32 %v194_v45, %v189_v47 }
 0x308   :  { %vm199_vm3 = vcmp.gt.f32.partialorder %v197_v49, 0.0  ;;  %v201_v50 = vmul.f32 0.01, %v197_v49  ;;  %v200_v52 = vmul.f32 0.01, %v196_v48  ;;  %vm198_vm4 = vcmp.gt.f32.partialorder %v196_v48, 0.0 }
 0x30a   :  { %v203_v51 = vsel %vm199_vm3, %v197_v49, %v201_v50  ;;  %v202_v53 = vsel %vm198_vm4, %v196_v48, %v200_v52 }
 0x30b   :  { %227 = vrot.lane.b32.xlu1 %v203_v51, %s458_s18 }
 0x30f   :  { %225 = vrot.lane.b32.xlu1 %v202_v53, %s458_s18 }
 0x313   :  { %217 = vrot.lane.b32.xlu1 %v203_v51, %s459_s20 }
 0x317   :  { %215 = vrot.lane.b32.xlu1 %v202_v53, %s459_s20 }
 0x37d   :  { %v228_v56 = vpop.permute.xlu1 %227 }
 0x37e   :  { %v232_v57 = vsel %vm70_vm0, %v228_v56, %v230_v54 }
 0x37f   :  { %265 = vmatprep.subr.mxu1 %v232_v57 }
 0x381   :  { %v226_v58 = vpop.permute.xlu1 %225 }
 0x382   :  { %v231_v59 = vsel %vm70_vm0, %v226_v58, %v228_v56 }
 0x383   :  { %266 = vmatpush1.msra.mxu1 %v231_v59 }
 0x385   :  { %v218_v60 = vpop.permute.xlu1 %217 }
 0x386   :  { %v222_v61 = vsel %vm59_vm1, %v218_v60, %v220_v55 }
 0x387   :  { %267 = vmatprep.subr.mxu1 %v222_v61 }
 0x389   :  { %v216_v62 = vpop.permute.xlu1 %215 }
 0x38a   :  { %v221_v63 = vsel %vm59_vm1, %v216_v62, %v218_v60 }
 0x38b   :  { %268 = vmatpush1.msra.mxu1 %v221_v63 }
 0x38c   :  { %269 = vmatprep.subr.mxu1 %v203_v51 }
 0x38d   :  { %270 = vmatpush1.msra.mxu1 %v202_v53 }
 0x38e   :  { %399 = vmatmul.mubr.msk.f32.vlgmr.msra.gmra.mxu1 %vm76_vm2, %v235_v2 }
 0x44e   :  { %v305_v7 = vpop.f32.mrf.mxu1 }
 0x44f   :  { %v322_v9 = vmul.f32 %v315_v5, %v305_v7 }
 0x450   :  { %v307_v8 = vpop.f32.mrf.mxu1 }
 0x451   :  { %v323_v10 = vmul.f32 %v319_v6, %v307_v8 }
 0x453   :  { %v324_v11 = vadd.f32 %v323_v10, %v322_v9 }
 0x455   :  { %325 = vadd.xlane.f32.xlu0 %v324_v11 }
 0x46b   :  { %363 = vrot.lane.b32.xlu0 %v523_v1, %s458_s18 }
 0x4de   :  { %v326_v12 = vpop.xlane.xlu0 %325 }
 0x4df   :  { %v327_v13 = vmul.f32 0.007246377, %v326_v12 }
 0x4e1   :  { %v328_v14 = vsub.f32 %v305_v7, %v327_v13  ;;  %v329_v15 = vsub.f32 %v307_v8, %v327_v13 }
 0x4e2   :  { %v364_v27 = vpop.permute.xlu0 %363 }
 0x4e3   :  { %v330_v19 = vmul.f32 %v328_v14, %v315_v5  ;;  %v331_v20 = vmul.f32 %v329_v15, %v319_v6 }
 0x4e5   :  { %v332_v21 = vmul.f32 %v330_v19, %v330_v19  ;;  %v333_v17 = vmul.f32 %v331_v20, %v331_v20 }
 0x4e7   :  { %v334_v22 = vadd.f32 %v333_v17, %v332_v21 }
 0x4e9   :  { %335 = vadd.xlane.f32.xlu1 %v334_v22 }
 0x4fa   :  { %355 = vperm.xlu1 %407, %v352_v16  }
 0x4fe   :  { %365 = vrot.lane.b32.xlu1 %v518_v0, %s458_s18 }
 0x572   :  { %v336_v18 = vpop.xlane.xlu1 %335 }
 0x573   :  { %v337_v1 = vmul.f32 0.007246377, %v336_v18 }
 0x575   :  { %v338_v23 = vadd.f32 1e-05, %v337_v1 }
 0x576   :  { %v356_v28 = vpop.permute.xlu1 %355 }
 0x577   :  { %410 = vrsqrt.f32 %v338_v23 }
 0x57a   :  { %v366_v30 = vpop.permute.xlu1 %365 }
 0x57b   :  { %v369_v34 = vsel %vm70_vm0, %v364_v27, %v366_v30 }
 0x584   :  { %v411_v25 = vpop.eup %410 }
 0x585   :  { %v341_v26 = vmul.f32 %v411_v25, %v340_v24 }
 0x587   :  { %347 = vperm.xlu0 %406, %v341_v26  }
 0x58b   :  { %367 = vrot.lane.b32.xlu0 %v532_v3, %s458_s18 }
 0x602   :  { %v348_v29 = vpop.permute.xlu0 %347 }
 0x603   :  { %v350_v31 = vmul.f32 %v348_v29, %v328_v14  ;;  %v351_v0 = vmul.f32 %v348_v29, %v329_v15 }
 0x605   :  { %v358_v32 = vadd.f32 %v356_v28, %v350_v31  ;;  %v359_v33 = vadd.f32 %v356_v28, %v351_v0 }
 0x606   :  { %v368_v35 = vpop.permute.xlu0 %367 }
 0x607   :  { %v373_v36 = vadd.f32 %v369_v34, %v358_v32  ;;  %v370_v37 = vsel %vm70_vm0, %v366_v30, %v368_v35 }
 0x608   :  { %v374_v38 = vadd.f32 %v370_v37, %v359_v33 }
 0x609   :  { %vm375_vm5 = vcmp.gt.f32.partialorder %v373_v36, 0.0  ;;  %v377_v39 = vmul.f32 0.01, %v373_v36 }
 0x60a   :  { %v378_v3 = vmul.f32 0.01, %v374_v38  ;;  %vm376_vm6 = vcmp.gt.f32.partialorder %v374_v38, 0.0 }
 0x60b   :  { %v379_v40 = vsel %vm375_vm5, %v373_v36, %v377_v39 }
 0x60c   :  { %v380_v41 = vsel %vm376_vm6, %v374_v38, %v378_v3  ;;  %381 = vst [vmem:[#allocation6] sm:$0xff] %v379_v40 }
 0x60d   :  { %382 = vst [vmem:[#allocation6 + $0x8] sm:$0xff] %v380_v41 }
 0x60e   :  { %443 = shalt.err (!%p440_p9)
}
 0x60f   :  { %392 = dma.vmem_to_hbm [thread:$0]  %s390_s6, 256, %s613_s9, [#allocation5]  }
 0x610   :  { %454 = dma.done.wait [#allocation5], 256  }
 0x611   :  { %455 = vsyncadd [#allocation5], 4294967040 }
 0x612   :  { %396 = vsyncpa [#allocation4], 1 }
 0x613   :  { %397 = vsyncpa [#allocation5], 1 }

</bundles_post_ra>
